<compile_context>
chip_gen: v6e
topology: v6e:2x2x1
jax: 0.10.0
libtpu: 0.0.40
codegen_flags: <defaults>
</compile_context>

<pallas_src>
import functools

import jax
import jax.numpy as jnp
from jax.experimental import pallas as pl
from jax.experimental.pallas import tpu as pltpu

SUBLANE = 8          # f32 sublane granularity (second-to-last dim)
MAX_TILE_B = 512     # biggest batch tile (85%+ of HBM roofline per measured data)


def _round_up(n, m):
    return ((n + m - 1) // m) * m


# ---------------------------------------------------------------------------
# Kernel: one batch tile per grid step.  All three weight matrices and biases
# use a constant index_map, so they are DMA'd once and stay VMEM-resident.
# Matmul inputs are cast to the weight dtype (f32 or bf16); accumulation, bias
# add and leaky_relu are always f32.
# ---------------------------------------------------------------------------
def mlg_kernel(x_ref, w1_ref, b1_ref, w2_ref, b2_ref, w3_ref, b3_ref, o_ref):
    mm_dtype = w1_ref.dtype

    x = x_ref[...]
    h = jnp.dot(x.astype(mm_dtype), w1_ref[...],
                preferred_element_type=jnp.float32) + b1_ref[...]
    h = jnp.maximum(h, 0.5 * h)                      # leaky_relu(., 0.5)

    h = jnp.dot(h.astype(mm_dtype), w2_ref[...],
                preferred_element_type=jnp.float32) + b2_ref[...]
    h = jnp.maximum(h, 0.5 * h)                      # leaky_relu(., 0.5)

    out = jnp.dot(h.astype(mm_dtype), w3_ref[...],
                  preferred_element_type=jnp.float32) + b3_ref[...]
    o_ref[...] = out.astype(o_ref.dtype)


# ---------------------------------------------------------------------------
# One-time parameter preparation: transpose weights to (in, out) and cast to the
# chosen matmul dtype.  Biases stay f32 (they are added to the f32 accumulator).
# No feature-dim padding anywhere.
# ---------------------------------------------------------------------------
def prepare_params(params, matmul_dtype=jnp.float32):
    f32 = jnp.float32
    return (
        jnp.asarray(params["W1"]).T.astype(matmul_dtype),      # (in,  hid)
        jnp.asarray(params["b1"]).astype(f32).reshape(1, -1),  # (1,   hid)
        jnp.asarray(params["W2"]).T.astype(matmul_dtype),      # (hid, hid)
        jnp.asarray(params["b2"]).astype(f32).reshape(1, -1),  # (1,   hid)
        jnp.asarray(params["W3"]).T.astype(matmul_dtype),      # (hid, out)
        jnp.asarray(params["b3"]).astype(f32).reshape(1, -1),  # (1,   out)
    )


def _choose_tile_b(batch):
    """Multiple of 8, capped at MAX_TILE_B, aiming for >=2 grid steps (v7x megacore)."""
    half = _round_up((batch + 1) // 2, SUBLANE)
    return max(SUBLANE, min(MAX_TILE_B, half))


def _vmem_limit_bytes(tile_b, in_size, hidden, out_size, w_itemsize):
    w_bytes = (in_size * hidden + hidden * hidden + hidden * out_size) * w_itemsize
    b_bytes = (2 * hidden + out_size) * 4
    io_tiles = tile_b * (in_size + out_size) * 4        # f32 x / out tiles
    act_bytes = 2 * tile_b * hidden * 4                 # f32 hidden activations
    total = 2 * (w_bytes + b_bytes) + 2 * io_tiles + act_bytes + (8 << 20)
    return int(min(max(total, 16 << 20), 64 << 20))     # v5e default too low; v7x cap 64 MiB


# ---------------------------------------------------------------------------
# Whole forward (pad + pallas_call + slice) under a single jax.jit.
# ---------------------------------------------------------------------------
@functools.partial(jax.jit, static_argnames=("tile_b",))
def _mlg_forward_impl(x, w1, b1, w2, b2, w3, b3, *, tile_b):
    B, in_size = x.shape
    hidden = w1.shape[1]
    out_size = w3.shape[1]

    Bp = _round_up(B, tile_b)
    x_pad = x if Bp == B else jnp.pad(x, ((0, Bp - B), (0, 0)))
    grid = (Bp // tile_b,)

    w_itemsize = jnp.dtype(w1.dtype).itemsize
    flops = 2 * Bp * (in_size * hidden + hidden * hidden + hidden * out_size)
    bytes_accessed = (
        Bp * (in_size + out_size) * 4
        + (in_size * hidden + hidden * hidden + hidden * out_size) * w_itemsize
        + (2 * hidden + out_size) * 4
    )

    def resident(arr):
        # Same block every grid step -> DMA'd once, stays VMEM-resident.
        return pl.BlockSpec(arr.shape, lambda i: (0, 0))

    out_pad = pl.pallas_call(
        mlg_kernel,
        out_shape=jax.ShapeDtypeStruct((Bp, out_size), x.dtype),
        grid=grid,
        in_specs=[
            pl.BlockSpec((tile_b, in_size), lambda i: (i, 0)),
            resident(w1), resident(b1),
            resident(w2), resident(b2),
            resident(w3), resident(b3),
        ],
        out_specs=pl.BlockSpec((tile_b, out_size), lambda i: (i, 0)),
        compiler_params=pltpu.CompilerParams(
            dimension_semantics=("parallel",),   # shard batch tiles over TCs (v7x)
            vmem_limit_bytes=_vmem_limit_bytes(
                tile_b, in_size, hidden, out_size, w_itemsize),
        ),
        cost_estimate=pl.CostEstimate(
            flops=flops, transcendentals=0, bytes_accessed=bytes_accessed),
    )(x_pad, w1, b1, w2, b2, w3, b3)

    return out_pad[:B]


def mlg_forward(x, prepared):
    """x: (B, input_size). prepared: output of prepare_params()."""
    tile_b = _choose_tile_b(x.shape[0])
    return _mlg_forward_impl(x, *prepared, tile_b=tile_b)


# ---------------------------------------------------------------------------
# Pure-JAX reference (matches the PyTorch forward exactly).
# ---------------------------------------------------------------------------
def mlg_reference(x, params):
    def leaky(v):
        return jnp.where(v >= 0, v, 0.5 * v)

    h = leaky(x @ params["W1"].T + params["b1"])
    h = leaky(h @ params["W2"].T + params["b2"])
    return h @ params["W3"].T + params["b3"]


def init_params(key, input_size, hidden_size, output_size):
    """Deterministic synthetic init (PyTorch nn.Linear shapes: W=(out,in), b=(out,))."""
    ks = jax.random.split(key, 6)

    def uniform(k, shape, fan_in):
        bound = 1.0 / jnp.sqrt(fan_in)
        return jax.random.uniform(k, shape, jnp.float32, -bound, bound)

    return {
        "W1": uniform(ks[0], (hidden_size, input_size), input_size),
        "b1": uniform(ks[1], (hidden_size,), input_size),
        "W2": uniform(ks[2], (hidden_size, hidden_size), hidden_size),
        "b2": uniform(ks[3], (hidden_size,), hidden_size),
        "W3": uniform(ks[4], (output_size, hidden_size), hidden_size),
        "b3": uniform(ks[5], (output_size,), hidden_size),
    }


if __name__ == "__main__":
    key = jax.random.PRNGKey(0)
    k_x, k_p = jax.random.split(key)

    batch, input_size, hidden_size, output_size = 8, 16, 32, 8
    x = jax.random.normal(k_x, (batch, input_size), jnp.float32)
    params = init_params(k_p, input_size, hidden_size, output_size)
    ref = mlg_reference(x, params)

    # f32 matmul path: exact parity with the PyTorch reference.
    out_f32 = jax.block_until_ready(
        mlg_forward(x, prepare_params(params, matmul_dtype=jnp.float32)))
    assert out_f32.shape == (batch, output_size)
    assert jnp.allclose(out_f32, ref, atol=1e-5, rtol=1e-5), "f32 path mismatch"

    # bf16 matmul-input fast path (v5e/v6e/v7x MXU); f32 accumulation & elementwise.
    out_bf16 = jax.block_until_ready(
        mlg_forward(x, prepare_params(params, matmul_dtype=jnp.bfloat16)))
    assert out_bf16.shape == (batch, output_size)
    assert jnp.allclose(out_bf16, ref, atol=5e-2, rtol=5e-2), "bf16 path mismatch"

    print("KERNEL_OK")
</pallas_src>

<mosaic_0001>
module attributes {stable_mosaic.version = 11 : i64} {
  func.func @mlg_kernel(%arg0: i32, %arg1: memref<8x16xf32, #tpu.memory_space<vmem>>, %arg2: memref<16x32xf32, #tpu.memory_space<vmem>>, %arg3: memref<1x32xf32, #tpu.memory_space<vmem>>, %arg4: memref<32x32xf32, #tpu.memory_space<vmem>>, %arg5: memref<1x32xf32, #tpu.memory_space<vmem>>, %arg6: memref<32x8xf32, #tpu.memory_space<vmem>>, %arg7: memref<1x8xf32, #tpu.memory_space<vmem>>, %arg8: memref<8x8xf32, #tpu.memory_space<vmem>>) attributes {dimension_semantics = [#tpu.dimension_semantics<parallel>], iteration_bounds = array<i64: 1>, scalar_prefetch = 0 : i64, scratch_operands = 0 : i64, tpu.core_type = #tpu.core_type<tc>, window_params = [{transform_indices = @transform_0, window_bounds = array<i64: 8, 16>}, {pipeline_mode = #tpu.pipeline_mode<synchronous>, transform_indices = @transform_1, window_bounds = array<i64: 16, 32>}, {pipeline_mode = #tpu.pipeline_mode<synchronous>, transform_indices = @transform_2, window_bounds = array<i64: 1, 32>}, {pipeline_mode = #tpu.pipeline_mode<synchronous>, transform_indices = @transform_3, window_bounds = array<i64: 32, 32>}, {pipeline_mode = #tpu.pipeline_mode<synchronous>, transform_indices = @transform_4, window_bounds = array<i64: 1, 32>}, {pipeline_mode = #tpu.pipeline_mode<synchronous>, transform_indices = @transform_5, window_bounds = array<i64: 32, 8>}, {pipeline_mode = #tpu.pipeline_mode<synchronous>, transform_indices = @transform_6, window_bounds = array<i64: 1, 8>}, {transform_indices = @transform_7, window_bounds = array<i64: 8, 8>}]} {
    %c0 = arith.constant 0 : index
    %c0_0 = arith.constant 0 : index
    %0 = vector.load %arg1[%c0, %c0_0] : memref<8x16xf32, #tpu.memory_space<vmem>>, vector<8x16xf32>
    %c0_1 = arith.constant 0 : index
    %c0_2 = arith.constant 0 : index
    %1 = vector.load %arg2[%c0_1, %c0_2] : memref<16x32xf32, #tpu.memory_space<vmem>>, vector<16x32xf32>
    %cst = arith.constant dense<0.000000e+00> : vector<8x32xf32>
    %2 = tpu.matmul %0, %1, %cst {dimension_numbers = #tpu.dot_dimension_numbers<[1], [0], [0], [1], [0, 0, 1, 1], [], []>} : vector<8x16xf32>, vector<16x32xf32>, vector<8x32xf32> -> vector<8x32xf32>
    %c0_3 = arith.constant 0 : index
    %c0_4 = arith.constant 0 : index
    %3 = vector.load %arg3[%c0_3, %c0_4] : memref<1x32xf32, #tpu.memory_space<vmem>>, vector<1x32xf32>
    %4 = vector.broadcast %3 : vector<1x32xf32> to vector<8x32xf32>
    %5 = arith.addf %2, %4 : vector<8x32xf32>
    %cst_5 = arith.constant 5.000000e-01 : f32
    %6 = vector.broadcast %cst_5 : f32 to vector<8x32xf32>
    %7 = arith.mulf %6, %5 : vector<8x32xf32>
    %8 = arith.maximumf %5, %7 : vector<8x32xf32>
    %c0_6 = arith.constant 0 : index
    %c0_7 = arith.constant 0 : index
    %9 = vector.load %arg4[%c0_6, %c0_7] : memref<32x32xf32, #tpu.memory_space<vmem>>, vector<32x32xf32>
    %cst_8 = arith.constant dense<0.000000e+00> : vector<8x32xf32>
    %10 = tpu.matmul %8, %9, %cst_8 {dimension_numbers = #tpu.dot_dimension_numbers<[1], [0], [0], [1], [0, 0, 1, 1], [], []>} : vector<8x32xf32>, vector<32x32xf32>, vector<8x32xf32> -> vector<8x32xf32>
    %c0_9 = arith.constant 0 : index
    %c0_10 = arith.constant 0 : index
    %11 = vector.load %arg5[%c0_9, %c0_10] : memref<1x32xf32, #tpu.memory_space<vmem>>, vector<1x32xf32>
    %12 = vector.broadcast %11 : vector<1x32xf32> to vector<8x32xf32>
    %13 = arith.addf %10, %12 : vector<8x32xf32>
    %cst_11 = arith.constant 5.000000e-01 : f32
    %14 = vector.broadcast %cst_11 : f32 to vector<8x32xf32>
    %15 = arith.mulf %14, %13 : vector<8x32xf32>
    %16 = arith.maximumf %13, %15 : vector<8x32xf32>
    %c0_12 = arith.constant 0 : index
    %c0_13 = arith.constant 0 : index
    %17 = vector.load %arg6[%c0_12, %c0_13] : memref<32x8xf32, #tpu.memory_space<vmem>>, vector<32x8xf32>
    %cst_14 = arith.constant dense<0.000000e+00> : vector<8x8xf32>
    %18 = tpu.matmul %16, %17, %cst_14 {dimension_numbers = #tpu.dot_dimension_numbers<[1], [0], [0], [1], [0, 0, 1, 1], [], []>} : vector<8x32xf32>, vector<32x8xf32>, vector<8x8xf32> -> vector<8x8xf32>
    %c0_15 = arith.constant 0 : index
    %c0_16 = arith.constant 0 : index
    %19 = vector.load %arg7[%c0_15, %c0_16] : memref<1x8xf32, #tpu.memory_space<vmem>>, vector<1x8xf32>
    %20 = vector.broadcast %19 : vector<1x8xf32> to vector<8x8xf32>
    %21 = arith.addf %18, %20 : vector<8x8xf32>
    %c0_17 = arith.constant 0 : index
    %c0_18 = arith.constant 0 : index
    %22 = vector.load %arg8[%c0_17, %c0_18] : memref<8x8xf32, #tpu.memory_space<vmem>>, vector<8x8xf32>
    tpu.vector_store %arg8[%c0_17, %c0_18], %21 {strides = array<i32>} : memref<8x8xf32, #tpu.memory_space<vmem>>, vector<8x8xf32>,
    return
  }
  func.func @transform_0(%arg0: i32) -> (i32, i32) {
    %c0_i32 = arith.constant 0 : i32
    %c0_i32_0 = arith.constant 0 : i32
    return %arg0, %c0_i32 : i32, i32
  }
  func.func @transform_1(%arg0: i32) -> (i32, i32) {
    %c0_i32 = arith.constant 0 : i32
    %c0_i32_0 = arith.constant 0 : i32
    %c0_i32_1 = arith.constant 0 : i32
    return %c0_i32, %c0_i32_0 : i32, i32
  }
  func.func @transform_2(%arg0: i32) -> (i32, i32) {
    %c0_i32 = arith.constant 0 : i32
    %c0_i32_0 = arith.constant 0 : i32
    %c0_i32_1 = arith.constant 0 : i32
    return %c0_i32, %c0_i32_0 : i32, i32
  }
  func.func @transform_3(%arg0: i32) -> (i32, i32) {
    %c0_i32 = arith.constant 0 : i32
    %c0_i32_0 = arith.constant 0 : i32
    %c0_i32_1 = arith.constant 0 : i32
    return %c0_i32, %c0_i32_0 : i32, i32
  }
  func.func @transform_4(%arg0: i32) -> (i32, i32) {
    %c0_i32 = arith.constant 0 : i32
    %c0_i32_0 = arith.constant 0 : i32
    %c0_i32_1 = arith.constant 0 : i32
    return %c0_i32, %c0_i32_0 : i32, i32
  }
  func.func @transform_5(%arg0: i32) -> (i32, i32) {
    %c0_i32 = arith.constant 0 : i32
    %c0_i32_0 = arith.constant 0 : i32
    %c0_i32_1 = arith.constant 0 : i32
    return %c0_i32, %c0_i32_0 : i32, i32
  }
  func.func @transform_6(%arg0: i32) -> (i32, i32) {
    %c0_i32 = arith.constant 0 : i32
    %c0_i32_0 = arith.constant 0 : i32
    %c0_i32_1 = arith.constant 0 : i32
    return %c0_i32, %c0_i32_0 : i32, i32
  }
  func.func @transform_7(%arg0: i32) -> (i32, i32) {
    %c0_i32 = arith.constant 0 : i32
    %c0_i32_0 = arith.constant 0 : i32
    return %arg0, %c0_i32 : i32, i32
  }
}

</mosaic_0001>

<bundles_post_ra>
// kernel: _mlg_forward_impl.1
= control target key start
LH: loop header
LB: loop body
LE: loop exit
PB: predicated region body
PF: predicated region fallthrough
CT: control target
= control target key end

     0   :  { %12 = vsyncpa [#allocation3], 0  ;;  %s540_s0 = inlined_call_operand.vmem [shape: f32[8,16], index: 0, kind: input, shape index: {}]   ;;  %s541_s1 = inlined_call_operand.hbm [shape: f32[16,32], index: 1, kind: input, shape index: {}]   ;;  %s542_s2 = inlined_call_operand.vmem [shape: f32[1,32], index: 2, kind: input, shape index: {}]   ;;  %s543_s3 = inlined_call_operand.vmem [shape: f32[32,32], index: 3, kind: input, shape index: {}]   ;;  %s544_s4 = inlined_call_operand.hbm [shape: f32[1,32], index: 4, kind: input, shape index: {}]   ;;  %s545_s5 = inlined_call_operand.vmem [shape: f32[32,8], index: 5, kind: input, shape index: {}]   ;;  %s546_s6 = inlined_call_operand.vmem [shape: f32[1,8], index: 6, kind: input, shape index: {}]   ;;  %s547_s7 = inlined_call_operand.hbm [shape: f32[8,8], index: 7, kind: output, shape index: {}]  }
   0x1   :  { %13 = vsyncpa [#allocation6], 0 }
   0x2   :  { %14 = vsyncpa [#allocation4], 0  ;;  %s449_s24 = smov [#allocation2]  }
   0x3   :  { %s22_s25 = sshll.u32 %s449_s24, 4  ;;  %s23_s25 = int_to_ptr.vmem [resolvable:$true] %s22_s25 }
   0x4   :  { %s391_s26 = scalar_lea.vmem %s23_s25, 256  ;;  %p396_p1 = scmp.lt.s32.totalorder %s23_s25, %s23_s25 }
   0x5   :  { %p392_p0 = scmp.ne.s32.totalorder %s23_s25, %s391_s26  ;;  %p397_p2 = scmp.lt.s32.totalorder %s391_s26, %s391_s26 }
   0x7   :  { %p398_p3 = por %p397_p2, %p396_p1 }
   0x9   :  { %p399_p4 = pnand %p398_p3, %p392_p0 }
   0xb   :  { %402 = shalt.err (!%p399_p4)
}
   0xc   :  { %s450_s27 = smov 128   ;;  %s451_s28 = smov 8  }
   0xd   :  { %28 = dma.hbm_to_vmem [thread:$0]  %s541_s1, 256, %s23_s25, [#allocation3], %s450_s27, %s450_s27, %s451_s28  }
   0xe   :  { %s452_s8 = smov [#allocation5]  }
   0xf   :  { %s39_s9 = sshll.u32 %s452_s8, 4  ;;  %s40_s9 = int_to_ptr.vmem [resolvable:$true] %s39_s9 }
  0x10   :  { %s411_s10 = scalar_lea.vmem %s40_s9, 16  ;;  %s415_s11 = scalar_lea.vmem %s40_s9, 32 }
  0x11   :  { %p412_p5 = scmp.ne.s32.totalorder %s40_s9, %s411_s10  ;;  %p416_p6 = scmp.lt.s32.totalorder %s40_s9, %s40_s9 }
  0x12   :  { %p417_p7 = scmp.lt.s32.totalorder %s415_s11, %s411_s10 }
  0x14   :  { %p418_p8 = por %p417_p7, %p416_p6 }
  0x16   :  { %p419_p9 = pnand %p418_p8, %p412_p5 }
  0x18   :  { %422 = shalt.err (!%p419_p9)
}
  0x19   :  { %42 = dma.hbm_to_vmem [thread:$0]  %s544_s4, 16, %s40_s9, [#allocation6]  }
  0x1a   :  { %443 = dma.done.wait [#allocation3], 256  }
  0x1b   :  { %444 = vsyncadd [#allocation3], 4294967040 }
  0x1c   :  { %445 = dma.done.wait [#allocation6], 16  }
  0x1d   :  { %446 = vsyncadd [#allocation6], 4294967280  ;;  %v453_v0 = vmov 0.0   ;;  %vm454_vm0 = vmmov 0   ;;  %v55_v1 = vld [vmem:[#allocation2 + $0x8] sm:$0xff]  ;;  %v54_v2 = vld [vmem:[#allocation2] sm:$0xff] }
  0x1e   :  { %347 = vmatprep.subr.mxu0 %v453_v0  ;;  %351 = vmatprep.mubr.msk.f32.mxu0 %vm454_vm0, %v453_v0  ;;  %v53_v3 = vld [vmem:[%s540_s0] sm:$0xff]  ;;  %vm63_vm1 = vcmask 130048   ;;  %v142_v4 = vld [vmem:[%s543_s3 + $0x18] sm:$0xff]  ;;  %v141_v5 = vld [vmem:[%s543_s3 + $0x10] sm:$0xff]  ;;  %vm150_vm2 = vcmask 261120   ;;  %s455_s8 = smov [#allocation7]  }
  0x1f   :  { %354 = vmatprep.subr.mxu1 %v453_v0  ;;  %362 = vmatprep.mubr.msk.f32.mxu1 %vm454_vm0, %v453_v0  ;;  %v140_v6 = vld [vmem:[%s543_s3 + $0x8] sm:$0xff]  ;;  %v139_v7 = vld [vmem:[%s543_s3] sm:$0xff]  ;;  %v229_v14 = vld [vmem:[%s545_s5 + $0x18] sm:$0xff]  ;;  %s318_s9 = sshll.u32 %s455_s8, 4  ;;  %vm310_vm3 = vcmask 64512   ;;  %s319_s9 = int_to_ptr.vmem [resolvable:$true] %s318_s9 }
  0x20   :  { %348 = vmatpush3.msra.mxu0 %v55_v1  ;;  %355 = vmatpush3.msra.mxu1 %v142_v4  ;;  %v328_v8 = vld [vmem:[%s542_s2] ss:$0 sm:$0xff]  ;;  %v228_v15 = vld [vmem:[%s545_s5 + $0x10] sm:$0xff]  ;;  %v227_v16 = vld [vmem:[%s545_s5 + $0x8] sm:$0xff]  ;;  %p428_p11 = scmp.lt.s32.totalorder %s319_s9, %s319_s9 }
  0x21   :  { %349 = vmatprep.subr.mxu0 %v453_v0  ;;  %356 = vmatprep.subr.mxu1 %v453_v0  ;;  %v226_v17 = vld [vmem:[%s545_s5] sm:$0xff]  ;;  %v330_v18 = vld [vmem:[#allocation5] ss:$0 sm:$0xff]  ;;  %s423_s5 = scalar_lea.vmem %s319_s9, 128 }
  0x22   :  { %350 = vmatpush3.msra.mxu0 %v54_v2  ;;  %357 = vmatpush3.msra.mxu1 %v141_v5  ;;  %v332_v24 = vld [vmem:[%s546_s6] ss:$0 sm:$0xff]  ;;  %p424_p10 = scmp.ne.s32.totalorder %s319_s9, %s423_s5  ;;  %p429_p12 = scmp.lt.s32.totalorder %s423_s5, %s423_s5 }
  0x23   :  { %352 = vmatmul.mubr.msk.f32.vlgmr.msra.gmra.mxu0 %vm63_vm1, %v53_v3  ;;  %365 = vmatprep.subr.mxu0 %v453_v0 }
  0x24   :  { %373 = vmatprep.mubr.msk.f32.mxu0 %vm454_vm0, %v453_v0  ;;  %358 = vmatprep.subr.mxu1 %v453_v0  ;;  %p430_p13 = por %p429_p12, %p428_p11 }
  0x25   :  { %359 = vmatpush3.msra.mxu1 %v140_v6  ;;  %366 = vmatpush3.msra.mxu0 %v229_v14 }
  0x26   :  { %360 = vmatprep.subr.mxu1 %v453_v0  ;;  %367 = vmatprep.subr.mxu0 %v453_v0  ;;  %p431_p0 = pnand %p430_p13, %p424_p10 }
  0x27   :  { %361 = vmatpush3.msra.mxu1 %v139_v7  ;;  %368 = vmatpush3.msra.mxu0 %v228_v15 }
  0x28   :  { %369 = vmatprep.subr.mxu0 %v453_v0 }
  0x29   :  { %370 = vmatpush3.msra.mxu0 %v227_v16 }
  0x2a   :  { %371 = vmatprep.subr.mxu0 %v453_v0 }
  0x2b   :  { %372 = vmatpush3.msra.mxu0 %v226_v17 }
  0xe3   :  { %v133_v9 = vpop.f32.mrf.mxu0 }
  0xe4   :  { %v134_v10 = vadd.f32 %v328_v8, %v133_v9 }
  0xe5   :  { %v353_v11 = vpop.f32.mrf.mxu0 }
  0xe6   :  { %v137_v12 = vmul.f32 0.5, %v134_v10 }
  0xe8   :  { %v138_v13 = vmax.f32 %v134_v10, %v137_v12 }
  0xea   :  { %363 = vmatmul.mubr.msk.f32.vlgmr.msra.gmra.mxu1 %vm150_vm2, %v138_v13 }
 0x1aa   :  { %v220_v19 = vpop.f32.mrf.mxu1 }
 0x1ab   :  { %v221_v20 = vadd.f32 %v330_v18, %v220_v19 }
 0x1ac   :  { %v364_v21 = vpop.f32.mrf.mxu1 }
 0x1ad   :  { %v224_v22 = vmul.f32 0.5, %v221_v20 }
 0x1af   :  { %v225_v23 = vmax.f32 %v221_v20, %v224_v22 }
 0x1b1   :  { %374 = vmatmul.mubr.msk.f32.vlgmr.msra.gmra.mxu0 %vm150_vm2, %v225_v23 }
 0x271   :  { %v306_v25 = vpop.f32.mrf.mxu0 }
 0x272   :  { %v307_v26 = vadd.f32 %v332_v24, %v306_v25 }
 0x273   :  { %v375_v27 = vpop.f32.mrf.mxu0 }
 0x274   :  { %311 = vst.msk [vmem:[#allocation7] sm:$0xff] %vm310_vm3, %v307_v26 }
 0x275   :  { %434 = shalt.err (!%p431_p0)
}
 0x276   :  { %321 = dma.vmem_to_hbm [thread:$0]  %s319_s9, 128, %s547_s7, [#allocation4]  }
 0x277   :  { %447 = dma.done.wait [#allocation4], 128  }
 0x278   :  { %448 = vsyncadd [#allocation4], 4294967168 }
 0x279   :  { %325 = vsyncpa [#allocation3], 1 }
 0x27a   :  { %326 = vsyncpa [#allocation6], 1 }
 0x27b   :  { %327 = vsyncpa [#allocation4], 1 }

</bundles_post_ra>
